<compile_context>
chip_gen: v7x
topology: tpu7x:2x2x1
jax: 0.10.0
libtpu: 0.0.40
codegen_flags: <defaults>
</compile_context>

<pallas_src>
import functools

import jax
import jax.numpy as jnp
from jax.experimental import pallas as pl
from jax.experimental.pallas import tpu as pltpu


def _round_up(x, m):
    return ((x + m - 1) // m) * m


def _tscov_kernel(xi_ref, xj_ref, w_ref, out_ref, *, size, stride, k_band,
                  lane_aligned):
    # xi_ref, xj_ref: (ROWS, L_pad)   pre-expanded pair rows, ROWS = B_BLK*R_PAD
    # w_ref:          (K_band, T_TILE) tile-invariant banded ones matrix
    # out_ref:        (ROWS, T_TILE)   covariance rows, T on the lane axis
    t_tile = out_ref.shape[-1]
    start = pl.program_id(1) * (t_tile * stride)
    if lane_aligned:
        start = pl.multiple_of(start, 128)

    xi = xi_ref[:, pl.ds(start, k_band)]          # (ROWS, K_band)
    xj = xj_ref[:, pl.ds(start, k_band)]

    # Local (per tile-slab) centering: covariance is shift-invariant per
    # feature, and a local constant keeps S - Si*Sj/size numerically tight.
    xi = xi - jnp.mean(xi, axis=-1, keepdims=True)
    xj = xj - jnp.mean(xj, axis=-1, keepdims=True)

    w = w_ref[...]                                 # (K_band, T_TILE)

    # Windowed sums via banded MXU matmuls (single big 2-D dot each).
    si = jnp.dot(xi, w, preferred_element_type=jnp.float32)        # sum_w xi
    sj = jnp.dot(xj, w, preferred_element_type=jnp.float32)        # sum_w xj
    sij = jnp.dot(xi * xj, w, preferred_element_type=jnp.float32)  # sum_w xi*xj

    inv_size = 1.0 / float(size)
    # size == 1 yields 0/0 = nan, matching the PyTorch reference's div-by-zero.
    denom = 1.0 / float(size - 1) if size > 1 else float("nan")

    cov = (sij - si * sj * inv_size) * denom
    out_ref[...] = cov.astype(out_ref.dtype)


def ts_cov(x, size=10, stride=1):
    """x: (B, F, L) -> (B, F*(F-1)//2, T) float32, matching TsCov.forward."""
    x = jnp.asarray(x, jnp.float32)
    b, f, l = x.shape
    p = f * (f - 1) // 2
    t = (l - size) // stride + 1
    if p == 0 or t <= 0:
        return jnp.zeros((b, p, max(t, 0)), dtype=jnp.float32)

    # Upper-triangle pair list (same order as the PyTorch loops), padded to a
    # multiple of 8 rows so every sublane is dense; padded rows are discarded.
    idx_i = [i for i in range(f) for j in range(i + 1, f)]
    idx_j = [j for i in range(f) for j in range(i + 1, f)]
    r_pad = _round_up(p, 8)
    idx_i += [0] * (r_pad - p)
    idx_j += [0] * (r_pad - p)
    idx_i = jnp.asarray(idx_i, jnp.int32)
    idx_j = jnp.asarray(idx_j, jnp.int32)

    # T tiling: lane-dense multiples of 128, at most 512 wide.
    t_tile = min(512, _round_up(t, 128))
    t_pad = _round_up(t, t_tile)
    n_t = t_pad // t_tile
    k_band = (t_tile - 1) * stride + size            # samples one tile touches
    l_pad = max(l, (t_pad - 1) * stride + size)      # keep in-kernel slices in bounds

    # VMEM-aware batch blocking (fit v7x 64 MiB as well as 128 MiB parts, and
    # fill ~256 MXU rows when the budget allows).
    try:
        vmem_cap = int(pltpu.get_tpu_info().vmem_capacity_bytes)
    except Exception:  # interpret mode / older runtimes
        vmem_cap = 64 * 1024 * 1024
    vmem_limit = int(min(vmem_cap // 2, 64 * 1024 * 1024))
    budget = int(vmem_limit * 0.6)
    per_b = r_pad * (16 * l_pad + 12 * k_band + 24 * t_tile)  # bytes / batch elem
    w_bytes = 2 * k_band * t_tile * 4
    b_blk_vmem = max(1, (budget - w_bytes) // max(per_b, 1))
    b_blk_mxu = max(1, -(-256 // r_pad))
    b_blk = max(1, min(b, b_blk_mxu, b_blk_vmem))
    if n_t == 1 and b > 1 and b // b_blk < 2:
        b_blk = (b + 1) // 2          # keep >= 2 parallel grid points (v7x: 2 TCs)
    b_pad = _round_up(b, b_blk)

    xp = x
    if b_pad != b or l_pad != l:
        xp = jnp.pad(xp, ((0, b_pad - b), (0, 0), (0, l_pad - l)))

    # Host-side pair-row expansion keeps the kernel purely 2-D while the big
    # matmul still gets B_BLK * R_PAD rows.
    xi_rows = xp[:, idx_i, :].reshape(b_pad * r_pad, l_pad)
    xj_rows = xp[:, idx_j, :].reshape(b_pad * r_pad, l_pad)

    # Tile-invariant band matrix: W[k, c] = 1 iff slab sample k is inside
    # window c of the tile (rows c*stride .. c*stride + size - 1).
    k_idx = jnp.arange(k_band, dtype=jnp.int32)[:, None]
    c0 = jnp.arange(t_tile, dtype=jnp.int32)[None, :] * stride
    w_band = ((k_idx >= c0) & (k_idx < c0 + size)).astype(jnp.float32)

    rows = b_blk * r_pad
    kernel = functools.partial(
        _tscov_kernel, size=size, stride=stride, k_band=k_band,
        lane_aligned=(t_tile * stride) % 128 == 0)

    out = pl.pallas_call(
        kernel,
        out_shape=jax.ShapeDtypeStruct((b_pad * r_pad, t_pad), jnp.float32),
        grid=(b_pad // b_blk, n_t),
        in_specs=[
            # Block index constant along the fast T axis -> the sequence slab
            # is DMA'd once per batch block, not once per (batch, tile) step.
            pl.BlockSpec((rows, l_pad), lambda bi, ti: (bi, 0)),
            pl.BlockSpec((rows, l_pad), lambda bi, ti: (bi, 0)),
            # Constant block index -> the small band matrix is fetched once.
            pl.BlockSpec((k_band, t_tile), lambda bi, ti: (0, 0)),
        ],
        out_specs=pl.BlockSpec((rows, t_tile), lambda bi, ti: (bi, ti)),
        compiler_params=pltpu.CompilerParams(
            dimension_semantics=("parallel", "parallel"),
            vmem_limit_bytes=vmem_limit,
        ),
    )(xi_rows, xj_rows, w_band)

    # Drop padded pair rows, padded batches and padded tail windows.
    return out.reshape(b_pad, r_pad, t_pad)[:b, :p, :t]


def _ts_cov_ref(x, size=10, stride=1):
    b, f, l = x.shape
    t = (l - size) // stride + 1
    win = jnp.stack([x[:, :, s * stride:s * stride + size] for s in range(t)],
                    axis=2)                                   # (B, F, T, size)
    win_c = win - win.mean(axis=-1, keepdims=True)
    cov = jnp.einsum('bitn,bjtn->bijt', win_c, win_c) / (size - 1)
    iu, ju = jnp.triu_indices(f, k=1)
    return cov[:, iu, ju, :]                                  # (B, P, T)


if __name__ == "__main__":
    key = jax.random.PRNGKey(0)
    B, F, L = 2, 4, 16
    size, stride = 10, 1
    x = jax.random.normal(key, (B, F, L), dtype=jnp.float32)

    out = jax.block_until_ready(ts_cov(x, size=size, stride=stride))

    ref = _ts_cov_ref(x, size=size, stride=stride)
    P = F * (F - 1) // 2
    T = (L - size) // stride + 1
    assert out.shape == (B, P, T), out.shape
    assert jnp.allclose(out, ref, atol=1e-5, rtol=1e-5), \
        float(jnp.max(jnp.abs(out - ref)))

    print("KERNEL_OK")
</pallas_src>

<mosaic_0001>
module attributes {stable_mosaic.version = 11 : i64} {
  func.func @_tscov_kernel(%arg0: i32, %arg1: i32, %arg2: memref<8x137xf32, #tpu.memory_space<vmem>>, %arg3: memref<8x137xf32, #tpu.memory_space<vmem>>, %arg4: memref<137x128xf32, #tpu.memory_space<vmem>>, %arg5: memref<8x128xf32, #tpu.memory_space<vmem>>) attributes {dimension_semantics = [#tpu.dimension_semantics<parallel>, #tpu.dimension_semantics<parallel>], iteration_bounds = array<i64: 2, 1>, scalar_prefetch = 0 : i64, scratch_operands = 0 : i64, tpu.core_type = #tpu.core_type<tc>, window_params = [{transform_indices = @transform_0, window_bounds = array<i64: 8, 137>}, {transform_indices = @transform_1, window_bounds = array<i64: 8, 137>}, {pipeline_mode = #tpu.pipeline_mode<synchronous>, transform_indices = @transform_2, window_bounds = array<i64: 137, 128>}, {transform_indices = @transform_3, window_bounds = array<i64: 8, 128>}]} {
    %c128_i32 = arith.constant 128 : i32
    %0 = arith.muli %arg1, %c128_i32 : i32
    %1 = tpu.assume_multiple %0, 128 : i32
    %c0 = arith.constant 0 : index
    %2 = arith.index_cast %1 : i32 to index
    %3 = vector.load %arg2[%c0, %2] : memref<8x137xf32, #tpu.memory_space<vmem>>, vector<8x137xf32>
    %c0_0 = arith.constant 0 : index
    %4 = arith.index_cast %1 : i32 to index
    %5 = vector.load %arg3[%c0_0, %4] : memref<8x137xf32, #tpu.memory_space<vmem>>, vector<8x137xf32>
    %cst = arith.constant dense<0.000000e+00> : vector<8xf32>
    %6 = vector.multi_reduction <add>, %3, %cst [1] : vector<8x137xf32> to vector<8xf32>
    %7 = vector.shape_cast %6 : vector<8xf32> to vector<8x1xf32>
    %cst_1 = arith.constant 1.370000e+02 : f32
    %8 = vector.broadcast %cst_1 : f32 to vector<8x1xf32>
    %9 = arith.divf %7, %8 : vector<8x1xf32>
    %10 = vector.broadcast %9 : vector<8x1xf32> to vector<8x137xf32>
    %11 = arith.subf %3, %10 : vector<8x137xf32>
    %cst_2 = arith.constant dense<0.000000e+00> : vector<8xf32>
    %12 = vector.multi_reduction <add>, %5, %cst_2 [1] : vector<8x137xf32> to vector<8xf32>
    %13 = vector.shape_cast %12 : vector<8xf32> to vector<8x1xf32>
    %cst_3 = arith.constant 1.370000e+02 : f32
    %14 = vector.broadcast %cst_3 : f32 to vector<8x1xf32>
    %15 = arith.divf %13, %14 : vector<8x1xf32>
    %16 = vector.broadcast %15 : vector<8x1xf32> to vector<8x137xf32>
    %17 = arith.subf %5, %16 : vector<8x137xf32>
    %c0_4 = arith.constant 0 : index
    %c0_5 = arith.constant 0 : index
    %18 = vector.load %arg4[%c0_4, %c0_5] : memref<137x128xf32, #tpu.memory_space<vmem>>, vector<137x128xf32>
    %cst_6 = arith.constant dense<0.000000e+00> : vector<8x128xf32>
    %19 = tpu.matmul %11, %18, %cst_6 {dimension_numbers = #tpu.dot_dimension_numbers<[1], [0], [0], [1], [0, 0, 1, 1], [], []>} : vector<8x137xf32>, vector<137x128xf32>, vector<8x128xf32> -> vector<8x128xf32>
    %cst_7 = arith.constant dense<0.000000e+00> : vector<8x128xf32>
    %20 = tpu.matmul %17, %18, %cst_7 {dimension_numbers = #tpu.dot_dimension_numbers<[1], [0], [0], [1], [0, 0, 1, 1], [], []>} : vector<8x137xf32>, vector<137x128xf32>, vector<8x128xf32> -> vector<8x128xf32>
    %21 = arith.mulf %11, %17 : vector<8x137xf32>
    %cst_8 = arith.constant dense<0.000000e+00> : vector<8x128xf32>
    %22 = tpu.matmul %21, %18, %cst_8 {dimension_numbers = #tpu.dot_dimension_numbers<[1], [0], [0], [1], [0, 0, 1, 1], [], []>} : vector<8x137xf32>, vector<137x128xf32>, vector<8x128xf32> -> vector<8x128xf32>
    %23 = arith.mulf %19, %20 : vector<8x128xf32>
    %cst_9 = arith.constant 1.000000e-01 : f32
    %24 = vector.broadcast %cst_9 : f32 to vector<8x128xf32>
    %25 = arith.mulf %23, %24 : vector<8x128xf32>
    %26 = arith.subf %22, %25 : vector<8x128xf32>
    %cst_10 = arith.constant 0.111111112 : f32
    %27 = vector.broadcast %cst_10 : f32 to vector<8x128xf32>
    %28 = arith.mulf %26, %27 : vector<8x128xf32>
    %c0_11 = arith.constant 0 : index
    %c0_12 = arith.constant 0 : index
    %29 = vector.load %arg5[%c0_11, %c0_12] : memref<8x128xf32, #tpu.memory_space<vmem>>, vector<8x128xf32>
    tpu.vector_store %arg5[%c0_11, %c0_12], %28 {strides = array<i32>} : memref<8x128xf32, #tpu.memory_space<vmem>>, vector<8x128xf32>,
    return
  }
  func.func @transform_0(%arg0: i32, %arg1: i32) -> (i32, i32) {
    %c0_i32 = arith.constant 0 : i32
    %c0_i32_0 = arith.constant 0 : i32
    return %arg0, %c0_i32 : i32, i32
  }
  func.func @transform_1(%arg0: i32, %arg1: i32) -> (i32, i32) {
    %c0_i32 = arith.constant 0 : i32
    %c0_i32_0 = arith.constant 0 : i32
    return %arg0, %c0_i32 : i32, i32
  }
  func.func @transform_2(%arg0: i32, %arg1: i32) -> (i32, i32) {
    %c0_i32 = arith.constant 0 : i32
    %c0_i32_0 = arith.constant 0 : i32
    %c0_i32_1 = arith.constant 0 : i32
    return %c0_i32, %c0_i32_0 : i32, i32
  }
  func.func @transform_3(%arg0: i32, %arg1: i32) -> (i32, i32) {
    %c0_i32 = arith.constant 0 : i32
    return %arg0, %arg1 : i32, i32
  }
}

</mosaic_0001>

<bundles_post_ra>
// kernel: tpu_custom_call.1
= control target key start
LH: loop header
LB: loop body
LE: loop exit
PB: predicated region body
PF: predicated region fallthrough
CT: control target
= control target key end

     0   :  { %s1385_s0 = inlined_call_operand.hbm [shape: f32[16,137], index: 0, kind: input, shape index: {}]   ;;  %s1386_s1 = inlined_call_operand.hbm [shape: f32[16,137], index: 1, kind: input, shape index: {}]   ;;  %s1387_s2 = inlined_call_operand.hbm [shape: f32[137,128], index: 2, kind: input, shape index: {}]   ;;  %s1388_s3 = inlined_call_operand.hbm [shape: f32[16,128], index: 3, kind: output, shape index: {}]  }
   0x1   :  { %1394 = sst [smem:[#allocation14_spill]] %s1387_s2 }
   0x2   :  { %8 = vsyncpa [#allocation3], 0 }
   0x3   :  { %10 = vsyncpa [#allocation3 + $0x1], 0 }
   0x4   :  { %11 = vsyncpa [#allocation6], 0 }
   0x5   :  { %13 = vsyncpa [#allocation6 + $0x1], 0 }
   0x6   :  { %14 = vsyncpa [#allocation4], 0 }
   0x7   :  { %16 = vsyncpa [#allocation4 + $0x1], 0  ;;  %s1060_s12 = smov 0   ;;  %s1062_s13 = smov 0  }
   0x8   :  { %s1064_s14 = smov 0   ;;  %s1066_s15 = smov 0  }
   0x9   :  { %s1068_s16 = smov 0   ;;  %s1070_s17 = smov 0  }
   0xa LB: > { %s1091_s18 = sadd.s32 4294967295, %s1030_s17   ;;  %s659_s19 = sadd.s32 4294967294, %s1030_s17   ;;  %s1030_s17 = sphi %s1070_s17, %s22_s17   ;;  %s1026_s16 = sphi %s1068_s16, %s1419_s16   ;;  %s1022_s15 = sphi %s1066_s15, %s1418_s15   ;;  %s1018_s14 = sphi %s1064_s14, %s1417_s14   ;;  %s1014_s13 = sphi %s1062_s13, %s1416_s13   ;;  %s1010_s12 = sphi %s1060_s12, %s1415_s12  }
   0xb   : > { %p54_p0 = scmp.ne.s32.totalorder %s1014_s13, %s1010_s12  ;;  %p1389_p1 = scmp.eq.s32.totalorder %s1091_s18, 0 }
   0xc   : > { %p133_p3 = scmp.eq.s32.totalorder %s659_s19, 1  ;;  %p660_p5 = scmp.ge.s32.totalorder %s1030_s17, 1 }
   0xd   : > { %p1100_p4 = por %p1389_p1, %p54_p0  ;;  %p140_p7 = scmp.lt.s32.totalorder %s1030_s17, 3 }
   0xe   : > { %p1105_p6 = por %p133_p3, %p54_p0  ;;  %s1032_s23 = smov [#allocation7]  }
   0xf   : > { %s1395_s20 = scalar_select %p1100_p4, 1, 0 }
  0x10   : > { %s1396_s21 = scalar_select %p1105_p6, 1, 0 }
  0x11   : > { %p1110_p8 = pnand %p660_p5, %p140_p7  ;;  %s152_s24 = sshll.u32 %s1032_s23, 4  ;;  %s153_s24 = int_to_ptr.vmem [resolvable:$true] %s152_s24 }
  0x12   : > { %s34_s26 = sadd.s32 1, %s1026_s16  ;;  %s1399_s2 = sld [smem:[#allocation14_spill]] }
  0x13   : > { %s1397_s22 = scalar_select %p1110_p8, 1, 0 }
  0x14   : > { %p780_p9 = pneg %p1110_p8 }
  0x16   : > { %p1119_p11 = pnand %p780_p9, %p1389_p1 }
  0x18   : > { %s852_s29 = scalar_lea.hbm %s1399_s2, 2304  ;;  %p854_p13 = pneg %p1119_p11 }
  0x19   : > { %p853_p12 = scmp.ne.s32.totalorder %s1399_s2, %s852_s29  ;;  %p859_p5 = scmp.lt.u32.totalorder %s852_s29, %s1399_s2 }
  0x1b   : > { %p855_p0 = pnand %p854_p13, %p853_p12 }
  0x1d   : > { %p856_p3 = pneg %p855_p0 }
  0x1f   : > { %p861_p7 = pnand %p859_p5, %p856_p3 }
  0x21   : > { %864 = shalt.err (!%p861_p7)
}
  0x22   : > { %s865_s7 = scalar_lea.vmem %s153_s24, 2304  ;;  %p873_p2 = scmp.lt.s32.totalorder %s153_s24, %s153_s24 }
  0x23   : > { %p866_p9 = scmp.ne.s32.totalorder %s153_s24, %s865_s7  ;;  %p874_p6 = scmp.lt.s32.totalorder %s865_s7, %s865_s7 }
  0x25   : > { %p868_p10 = pnand %p866_p9, %p854_p13  ;;  %p875_p4 = por %p874_p6, %p873_p2 }
  0x27   : > { %p869_p1 = pneg %p868_p10 }
  0x29   : > { %p876_p8 = pnand %p875_p4, %p869_p1 }
  0x2b   : > { %879 = shalt.err (!%p876_p8)
}
  0x2c   : > { %s1033_s8 = smov 128   ;;  %s1034_s9 = smov 8  }
  0x2d   : > { %783 = dma.hbm_to_vmem [thread:$0]  (!%p1119_p11), %s1399_s2, 2304, %s153_s24, [#allocation6], %s1033_s8, %s1033_s8, %s1034_s9  }
  0x2e   : > { %p36_p1 = scmp.ge.s32.totalorder %s34_s26, 2  ;;  %s41_s19 = sadd.s32 1, %s1018_s14 }
  0x2f   : > { %p48_p2 = scmp.ne.s32.totalorder %s1018_s14, %s1014_s13  ;;  %p49_p4 = scmp.eq.s32.totalorder %s1030_s17, 0 }
  0x30   : > { %s1421_s26 = smov (%p36_p1, %s34_s26), 0  ;;  %p1402_p8 = scmp.eq.s32.totalorder %s1091_s18, 1 }
  0x31   : > { %1400 = sst [smem:[#allocation13_spill]] %s1421_s26  ;;  %p1146_p6 = por %p49_p4, %p48_p2 }
  0x32   : > { %p1152_p10 = por %p1402_p8, %p48_p2  ;;  %s38_s27 = ssub.s32 %s1026_s16, %s1421_s26 }
  0x33   : > { %p796_p11 = scmp.lt.s32.totalorder %s1030_s17, 2  ;;  %p39_p12 = scmp.eq.s32.totalorder %s38_s27, 0 }
  0x34   : > { %s1403_s25 = scalar_select %p1152_p10, 1, 0 }
  0x35   : > { %s166_s24 = sand.u32 1, %s1018_s14   ;;  %s684_s30 = sshll.u32 %s1026_s16, 8 }
  0x36   : > { %s1160_s28 = sshll.u32 %s166_s24, 4  ;;  %s1169_s6 = scalar_lea.hbm %s1385_s0, %s684_s30 }
  0x37   : > { %s1163_s29 = scalar_select %p39_p12, %s1018_s14, %s41_s19  }
  0x38   : > { %s170_s7 = scalar_lea.vmem [#allocation2], %s1160_s28  ;;  %p1176_p13 = pnand %p796_p11, %p1146_p6 }
  0x39   : > { %s178_s8 = sshll.u32 %s170_s7, 4  ;;  %s1183_s19 = scalar_lea.hbm %s1386_s1, %s684_s30  ;;  %s1172_s8 = int_to_ptr.vmem [resolvable:$true] %s178_s8 }
  0x3a   : > { %s185_s27 = sand.u32 1, %s1030_s17   ;;  %s167_s4 = scalar_lea.sflag [#allocation3], %s166_s24 }
  0x3b   : > { %s880_s5 = scalar_lea.hbm %s1169_s6, 256  ;;  %p882_p3 = pneg %p1176_p13 }
  0x3c   : > { %p881_p0 = scmp.ne.s32.totalorder %s1169_s6, %s880_s5  ;;  %s885_s2 = scalar_lea.hbm %s1385_s0, 512 }
  0x3d   : > { %p886_p9 = scmp.lt.u32.totalorder %s1169_s6, %s1385_s0  ;;  %p887_p1 = scmp.lt.u32.totalorder %s885_s2, %s880_s5 }
  0x3e   : > { %p883_p5 = pnand %p882_p3, %p881_p0  ;;  %p889_p4 = scmp.lt.u32.totalorder %s880_s5, %s1169_s6 }
  0x3f   : > { %p888_p2 = por %p887_p1, %p886_p9 }
  0x40   : > { %p884_p7 = pneg %p883_p5 }
  0x41   : > { %p890_p6 = por %p889_p4, %p888_p2 }
  0x43   : > { %p891_p8 = pnand %p890_p6, %p884_p7 }
  0x45   : > { %894 = shalt.err (!%p891_p8)
}
  0x46   : > { %s895_s24 = scalar_lea.vmem %s1172_s8, 256  ;;  %s1035_s30 = smov [#allocation2]  }
  0x47   : > { %p896_p11 = scmp.ne.s32.totalorder %s1172_s8, %s895_s24  ;;  %s900_s11 = sshll.u32 %s1035_s30, 4  ;;  %s901_s11 = int_to_ptr.vmem [resolvable:$false] %s900_s11 }
  0x48   : > { %s902_s26 = scalar_lea.vmem %s901_s11, 512  ;;  %p903_p5 = scmp.lt.s32.totalorder %s1172_s8, %s901_s11 }
  0x49   : > { %p898_p12 = pnand %p896_p11, %p882_p3  ;;  %p904_p9 = scmp.lt.s32.totalorder %s902_s26, %s895_s24 }
  0x4b   : > { %p899_p0 = pneg %p898_p12  ;;  %p905_p1 = por %p904_p9, %p903_p5 }
  0x4d   : > { %p906_p2 = pnand %p905_p1, %p899_p0 }
  0x4f   : > { %909 = shalt.err (!%p906_p2)
}
  0x50   : > { %787 = dma.hbm_to_vmem [thread:$0]  (!%p1176_p13), %s1169_s6, 256, %s1172_s8, %s167_s4  }
  0x51   : > { %s189_s2 = scalar_lea.vmem [#allocation5], %s1160_s28  ;;  %s186_s23 = scalar_lea.sflag [#allocation6], %s185_s27 }
  0x52   : > { %s197_s5 = sshll.u32 %s189_s2, 4  ;;  %s910_s7 = scalar_lea.hbm %s1183_s19, 256  ;;  %s198_s5 = int_to_ptr.vmem [resolvable:$true] %s197_s5 }
  0x53   : > { %p911_p7 = scmp.ne.s32.totalorder %s1183_s19, %s910_s7  ;;  %s915_s30 = scalar_lea.hbm %s1386_s1, 512 }
  0x54   : > { %p916_p8 = scmp.lt.u32.totalorder %s1183_s19, %s1386_s1  ;;  %p917_p11 = scmp.lt.u32.totalorder %s915_s30, %s910_s7 }
  0x55   : > { %p913_p4 = pnand %p911_p7, %p882_p3  ;;  %p919_p0 = scmp.lt.u32.totalorder %s910_s7, %s1183_s19 }
  0x56   : > { %p918_p12 = por %p917_p11, %p916_p8 }
  0x57   : > { %p914_p6 = pneg %p913_p4 }
  0x58   : > { %p920_p5 = por %p919_p0, %p918_p12 }
  0x5a   : > { %p921_p9 = pnand %p920_p5, %p914_p6 }
  0x5c   : > { %924 = shalt.err (!%p921_p9)
}
  0x5d   : > { %s925_s28 = scalar_lea.vmem %s198_s5, 256  ;;  %s1036_s6 = smov [#allocation5]  }
  0x5e   : > { %p926_p1 = scmp.ne.s32.totalorder %s198_s5, %s925_s28  ;;  %s930_s8 = sshll.u32 %s1036_s6, 4  ;;  %s931_s8 = int_to_ptr.vmem [resolvable:$false] %s930_s8 }
  0x5f   : > { %s932_s27 = scalar_lea.vmem %s931_s8, 512  ;;  %p933_p4 = scmp.lt.s32.totalorder %s198_s5, %s931_s8 }
  0x60   : > { %p928_p2 = pnand %p926_p1, %p882_p3  ;;  %p934_p10 = scmp.lt.s32.totalorder %s932_s27, %s925_s28 }
  0x62   : > { %p929_p7 = pneg %p928_p2  ;;  %p935_p8 = por %p934_p10, %p933_p4 }
  0x64   : > { %p936_p11 = pnand %p935_p8, %p929_p7 }
  0x66   : > { %939 = shalt.err (!%p936_p11)
}
  0x67   : > { %790 = dma.hbm_to_vmem [thread:$0]  (!%p1176_p13), %s1183_s19, 256, %s198_s5, %s186_s23  }
  0x68   : > { %p1405_p6 = scmp.ne.s32.totalorder %s1397_s22, 0 }
  0x69   : > { %s1236_s4 = sand.u32 (!%p1405_p6), 1, %s1014_s13   ;;  %p1406_p3 = scmp.ne.s32.totalorder (!%p1405_p6), %s1395_s20, 0 }
  0x6a   : > { %206 = sbr.rel (%p1405_p6) target bundleno = 537 (0x219), region = 32  ;;  %s670_s2 = sshll.u32 (!%p1405_p6), %s1236_s4, 4 }
  0x6b   : > { %s209_s7 = scalar_lea.sflag (!%p1405_p6), [#allocation3], %s1236_s4  ;;  %s212_s10 = scalar_lea.vmem (!%p1405_p6), [#allocation2], %s670_s2 }
  0x71   : > { %993 = dma.done.wait (%p1406_p3), %s209_s7, 256  }
  0x72   : > { %995 = vsyncadd (%p1406_p3), %s209_s7, 4294967040  ;;  %s217_s9 = sand.u32 1, %s1091_s18   ;;  %s221_s22 = scalar_lea.vmem [#allocation5], %s670_s2 }
  0x73   : > { %s218_s19 = scalar_lea.sflag [#allocation6], %s217_s9 }
  0x74   : > { %997 = dma.done.wait (%p1406_p3), %s218_s19, 256  }
  0x75   : > { %999 = vsyncadd (%p1406_p3), %s218_s19, 4294967040  ;;  %p1407_p10 = scmp.eq.s32.totalorder %s1091_s18, 0 }
  0x77   : > { %1001 = dma.done.wait (%p1407_p10), [#allocation6], 2304   ;;  %p1408_p13 = pmov %p1407_p10 }
  0x78   : > { %v1037_v0 = vmov 0.0|0.0   ;;  %vm264_vm0 = vcmask 72704   ;;  %v1255_v1 = vld [vmem:[%s212_s10] sm:$0xff]  ;;  %v1257_v2 = vld [vmem:[%s212_s10 + $0x8] sm:$0xff]  ;;  %vm301_vm1 = vcmask 1040384   ;;  %vm1038_vm2 = vmmov 1  }
  0x79   : > { %1003 = vsyncadd (%p1408_p13), [#allocation6], 4294964992  ;;  %686 = vmatprep.subr.bf16.mxu0 %v1037_v0  ;;  %714 = vmatprep.subr.bf16.mxu1 %v1037_v0  ;;  %v1259_v3 = vld [vmem:[%s221_s22] sm:$0xff]  ;;  %v265_v4 = vsel %vm264_vm0, %v1257_v2, 0.0  ;;  %v1263_v5 = vld [vmem:[%s221_s22 + $0x8] sm:$0xff]  ;;  %s673_s18 = sshll.u32 %s1236_s4, 3 }
  0x7a   : > { %v280_v6 = vld [vmem:[#allocation7] sm:$0xff]  ;;  %v281_v7 = vld [vmem:[#allocation7 + $0x8] sm:$0xff]  ;;  %v266_v8 = vadd.f32 %v265_v4, %v1255_v1  ;;  %v273_v9 = vsel %vm264_vm0, %v1263_v5, 0.0  ;;  %v282_v11 = vld [vmem:[#allocation7 + $0x10] sm:$0xff]  ;;  %s681_s20 = sshll.u32 %s1022_s15, 7  ;;  %s252_s5 = scalar_lea.vmem [#allocation8], %s673_s18 }
  0x7b   : > { %v1268_v10 = vpack.c.bf16 %v281_v7, %v280_v6  ;;  %v283_v12 = vld [vmem:[#allocation7 + $0x18] sm:$0xff]  ;;  %v274_v13 = vadd.f32 %v273_v9, %v1259_v3  ;;  %v284_v15 = vld [vmem:[#allocation7 + $0x20] sm:$0xff]  ;;  %v285_v16 = vld [vmem:[#allocation7 + $0x28] sm:$0xff]  ;;  %s543_s23 = sshll.u32 %s252_s5, 4  ;;  %s1336_s11 = scalar_lea.hbm %s1388_s3, %s681_s20  ;;  %s1338_s23 = int_to_ptr.vmem [resolvable:$true] %s543_s23 }
  0x7c   : > { %267 = vadd.xlane.f32.xlu0 %v266_v8  ;;  %v1272_v14 = vpack.c.bf16 %v283_v12, %v282_v11  ;;  %v1278_v17 = vpack.c.bf16 %v285_v16, %v284_v15  ;;  %v286_v18 = vld [vmem:[#allocation7 + $0x30] sm:$0xff]  ;;  %v287_v19 = vld [vmem:[#allocation7 + $0x38] sm:$0xff]  ;;  %v288_v21 = vld [vmem:[#allocation7 + $0x40] sm:$0xff]  ;;  %s529_s26 = scalar_lea.sflag [#allocation4], %s1236_s4  ;;  %s940_s28 = scalar_lea.vmem %s1338_s23, 128 }
  0x7d   : > { %688 = vmatpush1.bf16.msra.mxu0 %v1268_v10  ;;  %716 = vmatpush1.bf16.msra.mxu1 %v1268_v10  ;;  %v1284_v20 = vpack.c.bf16 %v287_v19, %v286_v18  ;;  %v289_v22 = vld [vmem:[#allocation7 + $0x48] sm:$0xff]  ;;  %v290_v24 = vld [vmem:[#allocation7 + $0x50] sm:$0xff]  ;;  %v291_v25 = vld [vmem:[#allocation7 + $0x58] sm:$0xff]  ;;  %p941_p12 = scmp.ne.s32.totalorder %s1338_s23, %s940_s28  ;;  %p1411_p0 = scmp.ne.s32.totalorder %s1403_s25, 0 }
  0x7e   : > { %689 = vmatprep.subr.bf16.mxu0 %v1037_v0  ;;  %717 = vmatprep.subr.bf16.mxu1 %v1037_v0  ;;  %v699_v23 = vpack.c.bf16 %v289_v22, %v288_v21  ;;  %v702_v26 = vpack.c.bf16 %v291_v25, %v290_v24  ;;  %v292_v27 = vld [vmem:[#allocation7 + $0x60] sm:$0xff]  ;;  %v293_v28 = vld [vmem:[#allocation7 + $0x68] sm:$0xff]  ;;  %v294_v30 = vld [vmem:[#allocation7 + $0x70] sm:$0xff]  ;;  %s1039_s15 = smov [#allocation8]  }
  0x7f   : > { %v705_v29 = vpack.c.bf16 %v293_v28, %v292_v27  ;;  %v295_v31 = vld [vmem:[#allocation7 + $0x78] sm:$0xff]  ;;  %v296_v33 = vld [vmem:[#allocation7 + $0x80] sm:$0xff]  ;;  %v297_v34 = vld [vmem:[#allocation7 + $0x88] sm:$0x1]  ;;  %p942_p5 = pnand %p941_p12, %p1411_p0  ;;  %s944_s6 = sshll.u32 %s1039_s15, 4  ;;  %s945_s6 = int_to_ptr.vmem [resolvable:$false] %s944_s6 }
  0x80   : > { %275 = vadd.xlane.f32.xlu0 %v274_v13  ;;  %v708_v32 = vpack.c.bf16 %v295_v31, %v294_v30  ;;  %v711_v35 = vpack.c.bf16 %v297_v34, %v296_v33  ;;  %vm1300_vm3 = vmpackc.low %vm301_vm1, %vm1038_vm2  ;;  %s946_s8 = scalar_lea.vmem %s945_s6, 256  ;;  %p947_p1 = scmp.lt.s32.totalorder %s1338_s23, %s945_s6 }
  0x81   : > { %691 = vmatpush1.bf16.msra.mxu0 %v1272_v14  ;;  %719 = vmatpush1.bf16.msra.mxu1 %v1272_v14  ;;  %p943_p9 = pneg %p942_p5  ;;  %p948_p2 = scmp.lt.s32.totalorder %s946_s8, %s940_s28 }
  0x82   : > { %692 = vmatprep.subr.bf16.mxu0 %v1037_v0  ;;  %720 = vmatprep.subr.bf16.mxu1 %v1037_v0 }
  0x83   : > { %p949_p7 = por %p948_p2, %p947_p1 }
  0x85   : > { %694 = vmatpush1.bf16.msra.mxu0 %v1278_v17  ;;  %722 = vmatpush1.bf16.msra.mxu1 %v1278_v17  ;;  %p950_p4 = pnand %p949_p7, %p943_p9 }
  0x86   : > { %695 = vmatprep.subr.bf16.mxu0 %v1037_v0  ;;  %723 = vmatprep.subr.bf16.mxu1 %v1037_v0 }
  0x89   : > { %697 = vmatpush1.bf16.msra.mxu0 %v1284_v20  ;;  %725 = vmatpush1.bf16.msra.mxu1 %v1284_v20 }
  0x8a   : > { %698 = vmatprep.subr.bf16.mxu0 %v1037_v0  ;;  %726 = vmatprep.subr.bf16.mxu1 %v1037_v0 }
  0x8d   : > { %700 = vmatpush1.bf16.msra.mxu0 %v699_v23  ;;  %728 = vmatpush1.bf16.msra.mxu1 %v699_v23 }
  0x8e   : > { %701 = vmatprep.subr.bf16.mxu0 %v1037_v0  ;;  %729 = vmatprep.subr.bf16.mxu1 %v1037_v0 }
  0x91   : > { %703 = vmatpush1.bf16.msra.mxu0 %v702_v26  ;;  %731 = vmatpush1.bf16.msra.mxu1 %v702_v26 }
  0x92   : > { %704 = vmatprep.subr.bf16.mxu0 %v1037_v0  ;;  %732 = vmatprep.subr.bf16.mxu1 %v1037_v0 }
  0x95   : > { %706 = vmatpush1.bf16.msra.mxu0 %v705_v29  ;;  %734 = vmatpush1.bf16.msra.mxu1 %v705_v29 }
  0x96   : > { %707 = vmatprep.subr.bf16.mxu0 %v1037_v0  ;;  %735 = vmatprep.subr.bf16.mxu1 %v1037_v0 }
  0x99   : > { %709 = vmatpush1.bf16.msra.mxu0 %v708_v32  ;;  %737 = vmatpush1.bf16.msra.mxu1 %v708_v32 }
  0x9a   : > { %710 = vmatprep.subr.bf16.mxu0 %v1037_v0  ;;  %738 = vmatprep.subr.bf16.mxu1 %v1037_v0 }
  0x9d   : > { %713 = vmatpush1.bf16.msk.msra.mxu0 %vm1300_vm3, %v711_v35  ;;  %741 = vmatpush1.bf16.msk.msra.mxu1 %vm1300_vm3, %v711_v35 }
  0x9e   : > { %742 = vmatprep.subr.bf16.mxu0 %v1037_v0 }
 0x109   : > { %v268_v37 = vpop.xlane.xlu0 %267 }
 0x10a   : > { %v270_v38 = vmul.f32 0.00729927, %v268_v37 }
 0x10c   : > { %v271_v39 = vsub.f32 %v1255_v1, %v270_v38  ;;  %v272_v40 = vsub.f32 %v1257_v2, %v270_v38 }
 0x10d   : > { %v276_v41 = vpop.xlane.xlu0 %275 }
 0x10e   : > { %v277_v42 = vmul.f32 0.00729927, %v276_v41  ;;  %675 = vmatprep.mubr.msk.f32.mxu0 %vm264_vm0, %v272_v40 }
 0x10f   : > { %370 = vmatmul.mubr.f32.vlgmr.msra.gmra.mrb[0].mxu0 %v271_v39 }
 0x110   : > { %v278_v43 = vsub.f32 %v1259_v3, %v277_v42  ;;  %744 = vmatpush1.bf16.msra.mxu0 %v1268_v10  ;;  %v279_v44 = vsub.f32 %v1263_v5, %v277_v42 }
 0x111   : > { %745 = vmatprep.subr.bf16.mxu0 %v1037_v0 }
 0x112   : > { %677 = vmatprep.mubr.msk.f32.mxu1 %vm264_vm0, %v279_v44  ;;  %v449_v45 = vmul.f32 %v279_v44, %v272_v40  ;;  %v448_v46 = vmul.f32 %v278_v43, %v271_v39 }
 0x113   : > { %443 = vmatmul.mubr.f32.vlgmr.msra.gmra.mrb[0].mxu1 %v278_v43 }
 0x114   : > { %747 = vmatpush1.bf16.msra.mxu0 %v1272_v14  ;;  %679 = vmatprep.mubr.msk.f32.mxu0 %vm264_vm0, %v449_v45 }
 0x115   : > { %748 = vmatprep.subr.bf16.mxu0 %v1037_v0 }
 0x118   : > { %750 = vmatpush1.bf16.msra.mxu0 %v1278_v17 }
 0x119   : > { %751 = vmatprep.subr.bf16.mxu0 %v1037_v0 }
 0x11c   : > { %753 = vmatpush1.bf16.msra.mxu0 %v1284_v20 }
 0x11d   : > { %754 = vmatprep.subr.bf16.mxu0 %v1037_v0 }
 0x120   : > { %756 = vmatpush1.bf16.msra.mxu0 %v699_v23 }
 0x121   : > { %757 = vmatprep.subr.bf16.mxu0 %v1037_v0 }
 0x124   : > { %759 = vmatpush1.bf16.msra.mxu0 %v702_v26 }
 0x125   : > { %760 = vmatprep.subr.bf16.mxu0 %v1037_v0 }
 0x128   : > { %762 = vmatpush1.bf16.msra.mxu0 %v705_v29 }
 0x129   : > { %763 = vmatprep.subr.bf16.mxu0 %v1037_v0 }
 0x12c   : > { %765 = vmatpush1.bf16.msra.mxu0 %v708_v32 }
 0x12d   : > { %766 = vmatprep.subr.bf16.mxu0 %v1037_v0 }
 0x130   : > { %769 = vmatpush1.bf16.msk.msra.mxu0 %vm1300_vm3, %v711_v35 }
 0x133   : > { %518 = vmatmul.mubr.f32.vlgmr.msra.gmra.mrb[2].mxu0 %v448_v46 }
 0x1e2   : > { %v371_v47 = vpop.f32.mrb[0].mxu0 }
 0x1e3   : > { %v373_v48 = vpop.f32.mrb[1].mxu0 }
 0x1e6   : > { %v444_v49 = vpop.f32.mrb[0].mxu1 }
 0x1e7   : > { %v523_v50 = vmul.f32 %v444_v49, %v371_v47  ;;  %v446_v51 = vpop.f32.mrb[1].mxu1 }
 0x1e9   : > { %v524_v52 = vmul.f32 0.1, %v523_v50 }
 0x206   : > { %v519_v53 = vpop.f32.mrb[2].mxu0 }
 0x207   : > { %v525_v54 = vsub.f32 %v519_v53, %v524_v52  ;;  %v521_v55 = vpop.f32.mrb[3].mxu0 }
 0x209   : > { %v526_v56 = vmul.f32 0.11111111, %v525_v54 }
 0x20b   : > { %527 = vst [vmem:[%s252_s5] sm:$0xff] %v526_v56 }
 0x20c   : > { %953 = shalt.err (!%p950_p4)
}
 0x20d   : > { %s954_s27 = scalar_lea.hbm %s1336_s11, 128  ;;  %s958_s7 = scalar_lea.hbm %s1388_s3, 256 }
 0x20e   : > { %p955_p8 = scmp.ne.s32.totalorder %s1336_s11, %s954_s27  ;;  %p959_p3 = scmp.lt.u32.totalorder %s1336_s11, %s1388_s3 }
 0x20f   : > { %p960_p10 = scmp.lt.u32.totalorder %s958_s7, %s954_s27  ;;  %p962_p12 = scmp.lt.u32.totalorder %s954_s27, %s1336_s11 }
 0x210   : > { %p956_p11 = pnand %p955_p8, %p1411_p0 }
 0x211   : > { %p961_p13 = por %p960_p10, %p959_p3 }
 0x212   : > { %p957_p6 = pneg %p956_p11 }
 0x213   : > { %p963_p5 = por %p962_p12, %p961_p13 }
 0x215   : > { %p964_p9 = pnand %p963_p5, %p957_p6 }
 0x217   : > { %967 = shalt.err (!%p964_p9)
}
 0x218   : > { %778 = dma.vmem_to_hbm [thread:$0]  (%p1411_p0), %s1338_s23, 128, %s1336_s11, %s529_s26  }
 0x219 PF: > { %s555_s19 = sand.u32 1, %s1010_s12   ;;  %p1412_p1 = scmp.ne.s32.totalorder %s1396_s21, 0 }
 0x21a   : > { %p1413_p2 = scmp.ge.s32.totalorder %s1030_s17, 2  ;;  %s556_s22 = scalar_lea.sflag [#allocation4], %s555_s19 }
 0x21c   : > { %p792_p7 = pnand %p1413_p2, %p1412_p1 }
 0x21e   : > { %1005 = dma.done.wait (!%p792_p7), %s556_s22, 128  }
 0x21f   : > { %1007 = vsyncadd (!%p792_p7), %s556_s22, 4294967168  ;;  %s22_s17 = sadd.s32 1, %s1030_s17   ;;  %s1414_s25 = sld [smem:[#allocation13_spill]] }
 0x220   : > { %p19_p4 = scmp.ge.s32.totalorder %s22_s17, 4   ;;  %s1415_s12 = smov %s1014_s13 }
 0x221   : > { %s1416_s13 = smov %s1018_s14  ;;  %s1417_s14 = smov %s1163_s29 }
 0x222   : > { %s1418_s15 = smov %s1026_s16  ;;  %21 = sbr.rel (!%p19_p4) target bundleno = 10 (0xa), region = 96 }
 0x225   : > { %s1419_s16 = smov %s1414_s25 }
 0x229   :  { %561 = vsyncpa [#allocation3], 1 }
 0x22a   :  { %563 = vsyncpa [#allocation3 + $0x1], 1 }
 0x22b   :  { %564 = vsyncpa [#allocation6], 1 }
 0x22c   :  { %566 = vsyncpa [#allocation6 + $0x1], 1 }
 0x22d   :  { %567 = vsyncpa [#allocation4], 1 }
 0x22e   :  { %569 = vsyncpa [#allocation4 + $0x1], 1 }

</bundles_post_ra>
